<compile_context>
chip_gen: v5e
topology: v5e:2x2
jax: 0.10.0
libtpu: 0.0.40
codegen_flags: <defaults>
</compile_context>

<pallas_src>
import functools

import jax
import jax.numpy as jnp
from jax.experimental import pallas as pl
from jax.experimental.pallas import tpu as pltpu

_LANE = 128
_SUBLANE = 8


def _prod(shape):
    p = 1
    for s in shape:
        p *= s
    return p


def _round_up(x, m):
    return ((x + m - 1) // m) * m


def _mlp_exp_kernel(x_ref, w1_ref, b1_ref, w2_ref, b2_ref, o_ref):
    # Layer 1: (TM, D_in) @ (D_in, H)  -> f32 accumulate on the MXU, bias + ReLU on the VPU.
    h = jnp.dot(x_ref[...], w1_ref[...], preferred_element_type=jnp.float32)
    h = jnp.maximum(h + b1_ref[...], 0.0)
    # Layer 2 (no final activation in EmbeddingFeedForward): (TM, H) @ (H, D_out_padded).
    h = h.astype(w2_ref.dtype)  # no-op for f32; feeds the MXU bf16 when compute_dtype=bf16
    y = jnp.dot(h, w2_ref[...], preferred_element_type=jnp.float32)
    # exp() for Gamma shape/rate parameters (elementwise; column slicing happens in the wrapper).
    o_ref[...] = jnp.exp(y + b2_ref[...])


@functools.partial(jax.jit, static_argnames=("block_rows", "compute_dtype"))
def _mlp_exp(x_flat, w1, b1, w2, b2, *, block_rows, compute_dtype):
    """Fused Linear -> ReLU -> Linear -> exp over a row-padded, lane-padded problem."""
    batch, d_in = x_flat.shape
    hidden = w1.shape[1]
    d_out = w2.shape[1]

    # ---- lane-dense output: pad the output feature dim to a multiple of 128 -------------
    d_out_p = max(_LANE, _round_up(d_out, _LANE))
    w2_p = jnp.zeros((hidden, d_out_p), jnp.float32).at[:, :d_out].set(w2)
    b2_p = jnp.zeros((1, d_out_p), jnp.float32).at[:, :d_out].set(b2)

    # ---- batch tiling: rows padded to a multiple of the tile (tile multiple of 8) --------
    tm = min(_round_up(block_rows, _SUBLANE), _round_up(batch, _SUBLANE))
    b_pad = _round_up(batch, tm)
    if b_pad != batch:
        x_flat = jnp.zeros((b_pad, d_in), x_flat.dtype).at[:batch, :].set(x_flat)

    # ---- dtype policy: matmul inputs in compute_dtype, accumulate/bias/ReLU/exp in f32 ---
    x_c = x_flat.astype(compute_dtype)
    w1_c = w1.astype(compute_dtype)
    w2_c = w2_p.astype(compute_dtype)
    b1_f = b1.astype(jnp.float32)
    b2_f = b2_p.astype(jnp.float32)

    grid = (b_pad // tm,)

    y_exp = pl.pallas_call(
        _mlp_exp_kernel,
        out_shape=jax.ShapeDtypeStruct((b_pad, d_out_p), jnp.float32),
        grid_spec=pl.GridSpec(
            grid=grid,
            in_specs=[
                # x: one row-tile per grid step (double-buffered by Pallas).
                pl.BlockSpec((tm, d_in), lambda i: (i, 0)),
                # Weights / biases: constant index_map -> resident in VMEM across grid steps.
                pl.BlockSpec((d_in, hidden), lambda i: (0, 0)),
                pl.BlockSpec((1, hidden), lambda i: (0, 0)),
                pl.BlockSpec((hidden, d_out_p), lambda i: (0, 0)),
                pl.BlockSpec((1, d_out_p), lambda i: (0, 0)),
            ],
            out_specs=pl.BlockSpec((tm, d_out_p), lambda i: (i, 0)),
        ),
        compiler_params=pltpu.CompilerParams(
            # Rows are independent: parallel lets v7x shard the grid across both TCs.
            dimension_semantics=("parallel",),
            # Explicit scoped-VMEM budget (safe on v5e/v6e/v7x; problem fits with big margin).
            vmem_limit_bytes=32 * 1024 * 1024,
        ),
    )(x_c, w1_c, b1_f, w2_c, b2_f)

    return y_exp[:batch, :d_out]


def surrogate_gamma_forward(x, params, shape_shape, rate_shape, no_batch=False,
                            block_rows=256, compute_dtype=jnp.float32):
    """Returns (gamma_shape, gamma_rate) exactly as SurrogateGamma.forward computes them.

    compute_dtype=jnp.bfloat16 feeds the MXU bf16 inputs (f32 accumulation) on v6e/v7x;
    the default f32 matches the PyTorch module bit-for-bit in structure.
    """
    w1, b1, w2, b2 = params
    batch_size = x.shape[0]
    x_flat = x.reshape(batch_size, -1).astype(jnp.float32)

    d_out = w2.shape[1]
    shape_dim = _prod(shape_shape)
    rate_dim = _prod(rate_shape)
    assert d_out == shape_dim + rate_dim
    # The original module slices rate from index rate_dim (not shape_dim); that is only
    # correct when shape_dim == rate_dim.  Reproduce the quirk but guard it explicitly.
    assert shape_dim == rate_dim, "SurrogateGamma's rate slice assumes shape_dim == rate_dim"

    y_exp = _mlp_exp(x_flat, w1, b1, w2, b2,
                     block_rows=block_rows, compute_dtype=compute_dtype)

    # exp(y)[:, :shape_dim] == exp(y[:, :shape_dim]) (elementwise), so slicing after the
    # kernel reproduces the original semantics exactly, including the quirky rate slice.
    gamma_shape = y_exp[:, :shape_dim].reshape(batch_size, *shape_shape)
    gamma_rate = y_exp[:, rate_dim:].reshape(batch_size, *rate_shape)

    if no_batch:
        gamma_shape = jnp.squeeze(gamma_shape, axis=0)
        gamma_rate = jnp.squeeze(gamma_rate, axis=0)
    return gamma_shape, gamma_rate


def _reference_forward(x, params, shape_shape, rate_shape):
    """Pure-JAX reference of the PyTorch forward (f32)."""
    w1, b1, w2, b2 = params
    b = x.shape[0]
    xf = x.reshape(b, -1).astype(jnp.float32)
    h = jnp.maximum(xf @ w1 + b1, 0.0)
    y = h @ w2 + b2
    shape_dim = _prod(shape_shape)
    rate_dim = _prod(rate_shape)
    g_shape = jnp.exp(y[:, :shape_dim]).reshape(b, *shape_shape)
    g_rate = jnp.exp(y[:, rate_dim:]).reshape(b, *rate_shape)
    return g_shape, g_rate


def init_params(key, d_in, hidden, d_out):
    """Deterministic synthetic parameters for the 2-layer EmbeddingFeedForward."""
    k1, k2, k3, k4 = jax.random.split(key, 4)
    # Stored as (in, out); kernel computes x @ W + b  (== PyTorch x @ W.T + b).
    w1 = jax.random.normal(k1, (d_in, hidden), jnp.float32) * (1.0 / jnp.sqrt(d_in))
    b1 = jax.random.normal(k2, (1, hidden), jnp.float32) * 0.01
    w2 = jax.random.normal(k3, (hidden, d_out), jnp.float32) * (1.0 / jnp.sqrt(hidden))
    b2 = jax.random.normal(k4, (1, d_out), jnp.float32) * 0.01
    return w1, b1, w2, b2


if __name__ == "__main__":
    # Small shapes consistent with the module:
    #   input_shape = (4, 8, 8) -> flattened D_in = 256
    #   shape_shape = rate_shape = (1,) -> output_dim = 1 + 1 = 2
    #   num_layers = 2, hidden_dim = 128
    input_shape = (4, 8, 8)
    shape_shape = (1,)
    rate_shape = (1,)
    hidden_dim = 128
    d_in = _prod(input_shape)
    d_out = _prod(shape_shape) + _prod(rate_shape)

    key = jax.random.PRNGKey(0)
    kx, kp, kx2 = jax.random.split(key, 3)
    params = init_params(kp, d_in, hidden_dim, d_out)

    # --- case 1: small batch (grid collapses to one step; matches original module usage) ---
    batch = 8
    x = jax.random.normal(kx, (batch,) + input_shape, jnp.float32)
    gamma_shape, gamma_rate = surrogate_gamma_forward(x, params, shape_shape, rate_shape)
    jax.block_until_ready(gamma_shape)
    jax.block_until_ready(gamma_rate)
    ref_shape, ref_rate = _reference_forward(x, params, shape_shape, rate_shape)
    assert gamma_shape.shape == (batch,) + shape_shape
    assert gamma_rate.shape == (batch,) + rate_shape
    assert bool(jnp.all(gamma_shape > 0)) and bool(jnp.all(gamma_rate > 0))
    assert bool(jnp.allclose(gamma_shape, ref_shape, rtol=1e-5, atol=1e-5))
    assert bool(jnp.allclose(gamma_rate, ref_rate, rtol=1e-5, atol=1e-5))

    # --- case 2: larger, non-multiple-of-tile batch exercises row padding + batch tiling ---
    batch2 = 300
    x2 = jax.random.normal(kx2, (batch2,) + input_shape, jnp.float32)
    g_shape2, g_rate2 = surrogate_gamma_forward(x2, params, shape_shape, rate_shape,
                                                block_rows=128)
    jax.block_until_ready(g_shape2)
    ref_shape2, ref_rate2 = _reference_forward(x2, params, shape_shape, rate_shape)
    assert g_shape2.shape == (batch2,) + shape_shape
    assert bool(jnp.allclose(g_shape2, ref_shape2, rtol=1e-5, atol=1e-5))
    assert bool(jnp.allclose(g_rate2, ref_rate2, rtol=1e-5, atol=1e-5))

    # --- case 3: bf16 MXU inputs (v6e/v7x fast path), f32 accumulation / bias / ReLU / exp ---
    g_shape_bf, g_rate_bf = surrogate_gamma_forward(x2, params, shape_shape, rate_shape,
                                                    block_rows=128,
                                                    compute_dtype=jnp.bfloat16)
    jax.block_until_ready(g_shape_bf)
    assert bool(jnp.all(jnp.isfinite(g_shape_bf))) and bool(jnp.all(g_shape_bf > 0))
    assert bool(jnp.all(jnp.isfinite(g_rate_bf))) and bool(jnp.all(g_rate_bf > 0))

    print("KERNEL_OK")
</pallas_src>

<mosaic_0001>
module attributes {stable_mosaic.version = 11 : i64} {
  func.func @_mlp_exp_kernel(%arg0: i32, %arg1: memref<8x256xf32, #tpu.memory_space<vmem>>, %arg2: memref<256x128xf32, #tpu.memory_space<vmem>>, %arg3: memref<1x128xf32, #tpu.memory_space<vmem>>, %arg4: memref<128x128xf32, #tpu.memory_space<vmem>>, %arg5: memref<1x128xf32, #tpu.memory_space<vmem>>, %arg6: memref<8x128xf32, #tpu.memory_space<vmem>>) attributes {dimension_semantics = [#tpu.dimension_semantics<parallel>], iteration_bounds = array<i64: 1>, scalar_prefetch = 0 : i64, scratch_operands = 0 : i64, tpu.core_type = #tpu.core_type<tc>, window_params = [{transform_indices = @transform_0, window_bounds = array<i64: 8, 256>}, {pipeline_mode = #tpu.pipeline_mode<synchronous>, transform_indices = @transform_1, window_bounds = array<i64: 256, 128>}, {pipeline_mode = #tpu.pipeline_mode<synchronous>, transform_indices = @transform_2, window_bounds = array<i64: 1, 128>}, {pipeline_mode = #tpu.pipeline_mode<synchronous>, transform_indices = @transform_3, window_bounds = array<i64: 128, 128>}, {pipeline_mode = #tpu.pipeline_mode<synchronous>, transform_indices = @transform_4, window_bounds = array<i64: 1, 128>}, {transform_indices = @transform_5, window_bounds = array<i64: 8, 128>}]} {
    %c0 = arith.constant 0 : index
    %c0_0 = arith.constant 0 : index
    %0 = vector.load %arg1[%c0, %c0_0] : memref<8x256xf32, #tpu.memory_space<vmem>>, vector<8x256xf32>
    %c0_1 = arith.constant 0 : index
    %c0_2 = arith.constant 0 : index
    %1 = vector.load %arg2[%c0_1, %c0_2] : memref<256x128xf32, #tpu.memory_space<vmem>>, vector<256x128xf32>
    %cst = arith.constant dense<0.000000e+00> : vector<8x128xf32>
    %2 = tpu.matmul %0, %1, %cst {dimension_numbers = #tpu.dot_dimension_numbers<[1], [0], [0], [1], [0, 0, 1, 1], [], []>} : vector<8x256xf32>, vector<256x128xf32>, vector<8x128xf32> -> vector<8x128xf32>
    %c0_3 = arith.constant 0 : index
    %c0_4 = arith.constant 0 : index
    %3 = vector.load %arg3[%c0_3, %c0_4] : memref<1x128xf32, #tpu.memory_space<vmem>>, vector<1x128xf32>
    %4 = vector.broadcast %3 : vector<1x128xf32> to vector<8x128xf32>
    %5 = arith.addf %2, %4 : vector<8x128xf32>
    %cst_5 = arith.constant 0.000000e+00 : f32
    %6 = vector.broadcast %cst_5 : f32 to vector<8x128xf32>
    %7 = arith.maximumf %5, %6 : vector<8x128xf32>
    %c0_6 = arith.constant 0 : index
    %c0_7 = arith.constant 0 : index
    %8 = vector.load %arg4[%c0_6, %c0_7] : memref<128x128xf32, #tpu.memory_space<vmem>>, vector<128x128xf32>
    %cst_8 = arith.constant dense<0.000000e+00> : vector<8x128xf32>
    %9 = tpu.matmul %7, %8, %cst_8 {dimension_numbers = #tpu.dot_dimension_numbers<[1], [0], [0], [1], [0, 0, 1, 1], [], []>} : vector<8x128xf32>, vector<128x128xf32>, vector<8x128xf32> -> vector<8x128xf32>
    %c0_9 = arith.constant 0 : index
    %c0_10 = arith.constant 0 : index
    %10 = vector.load %arg5[%c0_9, %c0_10] : memref<1x128xf32, #tpu.memory_space<vmem>>, vector<1x128xf32>
    %11 = vector.broadcast %10 : vector<1x128xf32> to vector<8x128xf32>
    %12 = arith.addf %9, %11 : vector<8x128xf32>
    %13 = math.exp %12 : vector<8x128xf32>
    %c0_11 = arith.constant 0 : index
    %c0_12 = arith.constant 0 : index
    %14 = vector.load %arg6[%c0_11, %c0_12] : memref<8x128xf32, #tpu.memory_space<vmem>>, vector<8x128xf32>
    tpu.vector_store %arg6[%c0_11, %c0_12], %13 {strides = array<i32>} : memref<8x128xf32, #tpu.memory_space<vmem>>, vector<8x128xf32>,
    return
  }
  func.func @transform_0(%arg0: i32) -> (i32, i32) {
    %c0_i32 = arith.constant 0 : i32
    %c0_i32_0 = arith.constant 0 : i32
    return %arg0, %c0_i32 : i32, i32
  }
  func.func @transform_1(%arg0: i32) -> (i32, i32) {
    %c0_i32 = arith.constant 0 : i32
    %c0_i32_0 = arith.constant 0 : i32
    %c0_i32_1 = arith.constant 0 : i32
    return %c0_i32, %c0_i32_0 : i32, i32
  }
  func.func @transform_2(%arg0: i32) -> (i32, i32) {
    %c0_i32 = arith.constant 0 : i32
    %c0_i32_0 = arith.constant 0 : i32
    %c0_i32_1 = arith.constant 0 : i32
    return %c0_i32, %c0_i32_0 : i32, i32
  }
  func.func @transform_3(%arg0: i32) -> (i32, i32) {
    %c0_i32 = arith.constant 0 : i32
    %c0_i32_0 = arith.constant 0 : i32
    %c0_i32_1 = arith.constant 0 : i32
    return %c0_i32, %c0_i32_0 : i32, i32
  }
  func.func @transform_4(%arg0: i32) -> (i32, i32) {
    %c0_i32 = arith.constant 0 : i32
    %c0_i32_0 = arith.constant 0 : i32
    %c0_i32_1 = arith.constant 0 : i32
    return %c0_i32, %c0_i32_0 : i32, i32
  }
  func.func @transform_5(%arg0: i32) -> (i32, i32) {
    %c0_i32 = arith.constant 0 : i32
    %c0_i32_0 = arith.constant 0 : i32
    return %arg0, %c0_i32 : i32, i32
  }
}

</mosaic_0001>

<bundles_post_ra>
// kernel: _mlp_exp.1
= control target key start
LH: loop header
LB: loop body
LE: loop exit
PB: predicated region body
PF: predicated region fallthrough
CT: control target
= control target key end

     0   :  { %s339_s1 = inlined_call_operand.vmem [shape: f32[256,128], index: 1, kind: input, shape index: {}]   ;;  %s340_s3 = inlined_call_operand.vmem [shape: f32[128,128], index: 3, kind: input, shape index: {}]   ;;  %s341_s2 = inlined_call_operand.vmem [shape: f32[1,128], index: 2, kind: input, shape index: {}]   ;;  %s342_s0 = inlined_call_operand.vmem [shape: f32[8,256], index: 0, kind: input, shape index: {}]   ;;  %s343_s4 = inlined_call_operand.vmem [shape: f32[1,128], index: 4, kind: input, shape index: {}]   ;;  %s344_s5 = inlined_call_operand.vmem [shape: f32[8,128], index: 5, kind: output, shape index: {}]  }
   0x1   :  { %v37_v0 = vld [vmem:[%s339_s1 + $0x78] sm:$0xff]  ;;  %v36_v1 = vld [vmem:[%s339_s1 + $0x70] sm:$0xff]  ;;  %v35_v4 = vld [vmem:[%s339_s1 + $0x68] sm:$0xff] }
   0x2   :  { %v53_v2 = vld [vmem:[%s339_s1 + $0xf8] sm:$0xff]  ;;  %58 = vmatpush.msra.mxu0 %v37_v0  ;;  %v52_v3 = vld [vmem:[%s339_s1 + $0xf0] sm:$0xff]  ;;  %v51_v5 = vld [vmem:[%s339_s1 + $0xe8] sm:$0xff] }
   0x3   :  { %78 = vmatpush.msra.mxu1 %v53_v2  ;;  %v34_v6 = vld [vmem:[%s339_s1 + $0x60] sm:$0xff]  ;;  %v33_v8 = vld [vmem:[%s339_s1 + $0x58] sm:$0xff]  ;;  %v32_v10 = vld [vmem:[%s339_s1 + $0x50] sm:$0xff] }
   0x4   :  { %59 = vmatpush.msra.mxu0 %v36_v1  ;;  %v50_v7 = vld [vmem:[%s339_s1 + $0xe0] sm:$0xff]  ;;  %v49_v9 = vld [vmem:[%s339_s1 + $0xd8] sm:$0xff]  ;;  %v48_v11 = vld [vmem:[%s339_s1 + $0xd0] sm:$0xff] }
   0x5   :  { %79 = vmatpush.msra.mxu1 %v52_v3  ;;  %v31_v12 = vld [vmem:[%s339_s1 + $0x48] sm:$0xff]  ;;  %v114_v14 = vld [vmem:[%s340_s3 + $0x78] sm:$0xff]  ;;  %v113_v15 = vld [vmem:[%s340_s3 + $0x70] sm:$0xff] }
   0x6   :  { %60 = vmatpush.msra.mxu0 %v35_v4  ;;  %v47_v13 = vld [vmem:[%s339_s1 + $0xc8] sm:$0xff]  ;;  %v30_v16 = vld [vmem:[%s339_s1 + $0x40] sm:$0xff]  ;;  %119 = vmatpush.msra.mxu2 %v114_v14  ;;  %v29_v19 = vld [vmem:[%s339_s1 + $0x38] sm:$0xff] }
   0x7   :  { %80 = vmatpush.msra.mxu1 %v51_v5  ;;  %v46_v17 = vld [vmem:[%s339_s1 + $0xc0] sm:$0xff]  ;;  %v112_v18 = vld [vmem:[%s340_s3 + $0x68] sm:$0xff]  ;;  %v45_v20 = vld [vmem:[%s339_s1 + $0xb8] sm:$0xff] }
   0x8   :  { %61 = vmatpush.msra.mxu0 %v34_v6  ;;  %120 = vmatpush.msra.mxu2 %v113_v15  ;;  %v111_v21 = vld [vmem:[%s340_s3 + $0x60] sm:$0xff]  ;;  %v28_v22 = vld [vmem:[%s339_s1 + $0x30] sm:$0xff]  ;;  %v110_v24 = vld [vmem:[%s340_s3 + $0x58] sm:$0xff] }
   0x9   :  { %81 = vmatpush.msra.mxu1 %v50_v7  ;;  %v44_v23 = vld [vmem:[%s339_s1 + $0xb0] sm:$0xff]  ;;  %v27_v25 = vld [vmem:[%s339_s1 + $0x28] sm:$0xff]  ;;  %v26_v28 = vld [vmem:[%s339_s1 + $0x20] sm:$0xff] }
   0xa   :  { %62 = vmatpush.msra.mxu0 %v33_v8  ;;  %121 = vmatpush.msra.mxu2 %v112_v18  ;;  %v43_v26 = vld [vmem:[%s339_s1 + $0xa8] sm:$0xff]  ;;  %v109_v27 = vld [vmem:[%s340_s3 + $0x50] sm:$0xff]  ;;  %v42_v29 = vld [vmem:[%s339_s1 + $0xa0] sm:$0xff] }
   0xb   :  { %82 = vmatpush.msra.mxu1 %v49_v9  ;;  %v108_v30 = vld [vmem:[%s340_s3 + $0x48] sm:$0xff]  ;;  %v25_v31 = vld [vmem:[%s339_s1 + $0x18] sm:$0xff]  ;;  %v107_v33 = vld [vmem:[%s340_s3 + $0x40] sm:$0xff] }
   0xc   :  { %63 = vmatpush.msra.mxu0 %v32_v10  ;;  %122 = vmatpush.msra.mxu2 %v111_v21  ;;  %v41_v32 = vld [vmem:[%s339_s1 + $0x98] sm:$0xff]  ;;  %v24_v34 = vld [vmem:[%s339_s1 + $0x10] sm:$0xff]  ;;  %v23_v37 = vld [vmem:[%s339_s1 + $0x8] sm:$0xff] }
   0xd   :  { %83 = vmatpush.msra.mxu1 %v48_v11  ;;  %v40_v35 = vld [vmem:[%s339_s1 + $0x90] sm:$0xff]  ;;  %v106_v36 = vld [vmem:[%s340_s3 + $0x38] sm:$0xff]  ;;  %v39_v38 = vld [vmem:[%s339_s1 + $0x88] sm:$0xff] }
   0xe   :  { %64 = vmatpush.msra.mxu0 %v31_v12  ;;  %123 = vmatpush.msra.mxu2 %v110_v24  ;;  %v105_v39 = vld [vmem:[%s340_s3 + $0x30] sm:$0xff]  ;;  %v22_v40 = vld [vmem:[%s339_s1] sm:$0xff]  ;;  %v21_v43 = vld [vmem:[%s342_s0 + $0x8] sm:$0xff] }
   0xf   :  { %84 = vmatpush.msra.mxu1 %v47_v13  ;;  %v38_v41 = vld [vmem:[%s339_s1 + $0x80] sm:$0xff]  ;;  %v104_v44 = vld [vmem:[%s340_s3 + $0x28] sm:$0xff]  ;;  %v102_v46 = vld [vmem:[%s340_s3 + $0x18] sm:$0xff] }
  0x10   :  { %65 = vmatpush.msra.mxu0 %v30_v16  ;;  %124 = vmatpush.msra.mxu2 %v109_v27  ;;  %v20_v42 = vld [vmem:[%s342_s0] sm:$0xff]  ;;  %v101_v47 = vld [vmem:[%s340_s3 + $0x10] sm:$0xff]  ;;  %v100_v48 = vld [vmem:[%s340_s3 + $0x8] sm:$0xff] }
  0x11   :  { %85 = vmatpush.msra.mxu1 %v46_v17  ;;  %v103_v45 = vld [vmem:[%s340_s3 + $0x20] sm:$0xff] }
  0x12   :  { %66 = vmatpush.msra.mxu0 %v29_v19  ;;  %125 = vmatpush.msra.mxu2 %v108_v30  ;;  %v99_v49 = vld [vmem:[%s340_s3] sm:$0xff] }
  0x13   :  { %86 = vmatpush.msra.mxu1 %v45_v20  ;;  %v146_v50 = vld [vmem:[%s341_s2] ss:$0 sm:$0xff] }
  0x14   :  { %67 = vmatpush.msra.mxu0 %v28_v22  ;;  %126 = vmatpush.msra.mxu2 %v107_v33  ;;  %v147_v56 = vld [vmem:[%s343_s4] ss:$0 sm:$0xff] }
  0x15   :  { %87 = vmatpush.msra.mxu1 %v44_v23 }
  0x16   :  { %68 = vmatpush.msra.mxu0 %v27_v25  ;;  %127 = vmatpush.msra.mxu2 %v106_v36 }
  0x17   :  { %88 = vmatpush.msra.mxu1 %v43_v26 }
  0x18   :  { %69 = vmatpush.msra.mxu0 %v26_v28  ;;  %128 = vmatpush.msra.mxu2 %v105_v39 }
  0x19   :  { %89 = vmatpush.msra.mxu1 %v42_v29 }
  0x1a   :  { %70 = vmatpush.msra.mxu0 %v25_v31  ;;  %129 = vmatpush.msra.mxu2 %v104_v44 }
  0x1b   :  { %90 = vmatpush.msra.mxu1 %v41_v32 }
  0x1c   :  { %71 = vmatpush.msra.mxu0 %v24_v34  ;;  %130 = vmatpush.msra.mxu2 %v103_v45 }
  0x1d   :  { %91 = vmatpush.msra.mxu1 %v40_v35 }
  0x1e   :  { %72 = vmatpush.msra.mxu0 %v23_v37  ;;  %131 = vmatpush.msra.mxu2 %v102_v46 }
  0x1f   :  { %92 = vmatpush.msra.mxu1 %v39_v38 }
  0x20   :  { %73 = vmatpush.msra.mxu0 %v22_v40  ;;  %132 = vmatpush.msra.mxu2 %v101_v47 }
  0x21   :  { %93 = vmatpush.msra.mxu1 %v38_v41  ;;  %74 = vmatmul.f32.vlgmr.msra.gmra.mxu0 %v20_v42 }
  0x22   :  { %94 = vmatmul.f32.vlgmr.msra.gmra.mxu1 %v21_v43  ;;  %133 = vmatpush.msra.mxu2 %v100_v48 }
  0x24   :  { %134 = vmatpush.msra.mxu2 %v99_v49 }
  0x9e   :  { %v75_v51 = vpop.f32.mrf.mxu0 }
  0x9f   :  { %v95_v52 = vpop.f32.mrf.mxu1  ;;  %v76_v53 = vadd.f32 %v146_v50, %v75_v51 }
  0xa1   :  { %v96_v54 = vadd.f32 %v95_v52, %v76_v53 }
  0xa3   :  { %v98_v55 = vmax.f32 %v96_v54, 0.0 }
  0xa5   :  { %135 = vmatmul.f32.vlgmr.msra.gmra.mxu2 %v98_v55 }
 0x128   :  { %v136_v57 = vpop.f32.mrf.mxu2 }
 0x129   :  { %v137_v58 = vadd.f32 %v147_v56, %v136_v57 }
 0x12b   :  { %v139_v59 = vmul.f32 1.442695, %v137_v58 }
 0x12d   :  { %148 = vpow2.f32 %v139_v59 }
 0x133   :  { %v149_v60 = vpop.eup %148 }
 0x134   :  { %141 = vst [vmem:[%s344_s5] sm:$0xff] %v149_v60 }

</bundles_post_ra>
